<compile_context>
chip_gen: v5e
topology: v5e:2x2
jax: 0.10.0
libtpu: 0.0.40
codegen_flags: <defaults>
</compile_context>

<pallas_src>
import functools

import jax
import jax.numpy as jnp
from jax.experimental import pallas as pl
from jax.experimental.pallas import tpu as pltpu


# ----------------------------- Pallas kernel ------------------------------ #
def _conv1x1_relu_kernel(x_ref, w_ref, b_ref, o_ref):
    # x_ref: (Cin, t_hw)   w_ref: (Cout, Cin)   b_ref: (Cout, 1)
    # o_ref: (Cout, t_hw)
    y = jnp.dot(w_ref[...], x_ref[...], preferred_element_type=jnp.float32)
    y = y + b_ref[...]                       # f32 epilogue, broadcast over lanes
    o_ref[...] = jnp.maximum(y, 0.0).astype(o_ref.dtype)


def _pick_hw_tile(hw, cin, cout, itemsize, vmem_budget):
    """Largest H*W tile (multiple of 128) whose double-buffered working set
    fits the VMEM budget. Falls back to the full (small) spatial extent."""
    if hw <= 128:
        return hw                            # full-dim block (lane dim = hw)
    for t in (2048, 1024, 512, 256, 128):
        if t > hw:
            continue
        need = (2 * cin * t            # x tile, double-buffered
                + 2 * cout * t         # output tile, double-buffered
                + 2 * cin * cout       # weight (conservatively x2)
                + cout) * itemsize
        if need <= vmem_budget:
            return t
    return 128


def conv1x1_relu_nchw(x_nchw, w, b, *, vmem_budget=40 << 20):
    """1x1 conv + bias + ReLU in NCHW layout.

    x_nchw: (N, Cin, H, W)   w: (Cout, Cin)   b: (Cout,)
    Returns (N, Cout, H, W) with dtype == x_nchw.dtype (f32 accumulation).
    """
    N, Cin, H, W = x_nchw.shape
    Cout = w.shape[0]
    HW = H * W

    x3 = x_nchw.reshape(N, Cin, HW)          # contiguous -> free reshape
    b2 = b.reshape(Cout, 1)

    itemsize = x3.dtype.itemsize
    t = _pick_hw_tile(HW, Cin, Cout, itemsize, vmem_budget)
    grid = (N, pl.cdiv(HW, t))

    flops = 2 * N * HW * Cin * Cout
    bytes_accessed = (x3.size * itemsize
                      + w.size * w.dtype.itemsize
                      + b2.size * b2.dtype.itemsize
                      + N * Cout * HW * itemsize)

    out = pl.pallas_call(
        _conv1x1_relu_kernel,
        out_shape=jax.ShapeDtypeStruct((N, Cout, HW), x3.dtype),
        grid_spec=pltpu.PrefetchScalarGridSpec(
            num_scalar_prefetch=0,
            grid=grid,
            in_specs=[
                # x: one image, all channels, one HW tile (lane-dense).
                pl.BlockSpec((None, Cin, t), lambda n, j: (n, 0, j)),
                # weight / bias: constant block index -> resident, fetched once.
                pl.BlockSpec((Cout, Cin), lambda n, j: (0, 0)),
                pl.BlockSpec((Cout, 1), lambda n, j: (0, 0)),
            ],
            out_specs=pl.BlockSpec((None, Cout, t), lambda n, j: (n, 0, j)),
        ),
        compiler_params=pltpu.CompilerParams(
            dimension_semantics=("parallel", "parallel"),
            vmem_limit_bytes=48 << 20,
        ),
        cost_estimate=pl.CostEstimate(
            flops=flops, transcendentals=0, bytes_accessed=bytes_accessed),
    )(x3, w, b2)

    return out.reshape(N, Cout, H, W)


# ------------------------------ FPNLinear ---------------------------------- #
def nearest_upsample(x_nchw, scale):
    """Nearest-neighbor upsample (== F.interpolate(mode='nearest'), int scale).

    Single broadcast + reshape (one materialization) instead of two
    jnp.repeat passes.  Pure data movement; write-bandwidth bound.
    """
    n, c, h, w = x_nchw.shape
    y = jnp.broadcast_to(x_nchw[:, :, :, None, :, None],
                         (n, c, h, scale, w, scale))
    return y.reshape(n, c, h * scale, w * scale)
    # TODO(synk): the replicated pyramid writes could be fused into the conv
    # kernel as extra outputs for a further ~10-20% end-to-end win.


def init_fpn_linear_params(key, in_channels, out_channels):
    """Xavier-uniform 1x1 conv weight (as in init_weights), zero bias.

    Weight stored as (Cout, Cin) to match the kernel's matmul layout.
    """
    fan_in, fan_out = in_channels, out_channels
    bound = (6.0 / (fan_in + fan_out)) ** 0.5
    w = jax.random.uniform(
        key, (out_channels, in_channels), minval=-bound, maxval=bound,
        dtype=jnp.float32,
    )
    b = jnp.zeros((out_channels,), dtype=jnp.float32)
    return w, b


def fpn_linear_forward(inputs, w, b, num_outs):
    """inputs: tuple/list with exactly one NCHW tensor. Returns tuple of num_outs."""
    assert len(inputs) == 1
    x = inputs[0]                                      # (N, Cin, H, W)
    feat = conv1x1_relu_nchw(x, w, b)                  # (N, Cout, H, W)
    outs = [feat]
    for i in range(num_outs - 1):
        outs.append(nearest_upsample(feat, 2 ** (i + 1)))
    outs = outs[::-1]
    return tuple(outs)


# --------------------------------- main ------------------------------------ #
if __name__ == "__main__":
    key = jax.random.PRNGKey(0)
    k_x, k_w, k_b = jax.random.split(key, 3)

    # Small, in-spirit shapes (module defaults are in=2048, out=256).
    batch, in_channels, out_channels, spatial, num_outs = 2, 32, 16, 16, 3

    x = jax.random.normal(k_x, (batch, in_channels, spatial, spatial),
                          dtype=jnp.float32)
    w, b = init_fpn_linear_params(k_w, in_channels, out_channels)
    # Use a nonzero bias so the bias path is actually exercised.
    b = 0.1 * jax.random.normal(k_b, (out_channels,), dtype=jnp.float32)

    fwd = jax.jit(functools.partial(fpn_linear_forward, num_outs=num_outs))

    # --- f32 path (exact semantics of the PyTorch module) -----------------
    outs = jax.block_until_ready(fwd((x,), w, b))

    # Pure-JAX reference (independent upsample via jnp.repeat).
    feat_ref = jnp.maximum(
        jnp.einsum("oc,nchw->nohw", w, x) + b[None, :, None, None], 0.0
    )

    def _repeat_upsample(t, s):
        return jnp.repeat(jnp.repeat(t, s, axis=2), s, axis=3)

    refs = [feat_ref] + [_repeat_upsample(feat_ref, 2 ** (i + 1))
                         for i in range(num_outs - 1)]
    refs = refs[::-1]

    assert len(outs) == num_outs
    for o, r in zip(outs, refs):
        assert o.shape == r.shape
        assert jnp.allclose(o, r, atol=1e-5, rtol=1e-5)

    # --- bf16 path (halves HBM bytes; f32 accumulation inside the kernel) --
    outs_bf16 = jax.block_until_ready(
        fwd((x.astype(jnp.bfloat16),), w.astype(jnp.bfloat16), b))
    for o, r in zip(outs_bf16, refs):
        assert o.shape == r.shape
        assert o.dtype == jnp.bfloat16
        assert jnp.allclose(o.astype(jnp.float32), r, atol=1e-1, rtol=5e-2)

    print("KERNEL_OK")
</pallas_src>

<mosaic_0001>
module attributes {stable_mosaic.version = 11 : i64} {
  func.func @_conv1x1_relu_kernel(%arg0: i32, %arg1: i32, %arg2: memref<1x32x256xf32, #tpu.memory_space<vmem>>, %arg3: memref<16x32xf32, #tpu.memory_space<vmem>>, %arg4: memref<16x1xf32, #tpu.memory_space<vmem>>, %arg5: memref<1x16x256xf32, #tpu.memory_space<vmem>>) attributes {dimension_semantics = [#tpu.dimension_semantics<parallel>, #tpu.dimension_semantics<parallel>], iteration_bounds = array<i64: 2, 1>, scalar_prefetch = 0 : i64, scratch_operands = 0 : i64, tpu.core_type = #tpu.core_type<tc>, window_params = [{transform_indices = @transform_0, window_bounds = array<i64: 1, 32, 256>}, {pipeline_mode = #tpu.pipeline_mode<synchronous>, transform_indices = @transform_1, window_bounds = array<i64: 16, 32>}, {pipeline_mode = #tpu.pipeline_mode<synchronous>, transform_indices = @transform_2, window_bounds = array<i64: 16, 1>}, {transform_indices = @transform_3, window_bounds = array<i64: 1, 16, 256>}]} {
    %c0 = arith.constant 0 : index
    %c0_0 = arith.constant 0 : index
    %0 = vector.load %arg3[%c0, %c0_0] : memref<16x32xf32, #tpu.memory_space<vmem>>, vector<16x32xf32>
    %c0_1 = arith.constant 0 : index
    %c0_2 = arith.constant 0 : index
    %c0_3 = arith.constant 0 : index
    %1 = vector.load %arg2[%c0_1, %c0_2, %c0_3] : memref<1x32x256xf32, #tpu.memory_space<vmem>>, vector<1x32x256xf32>
    %2 = vector.shape_cast %1 : vector<1x32x256xf32> to vector<32x256xf32>
    %cst = arith.constant dense<0.000000e+00> : vector<16x256xf32>
    %3 = tpu.matmul %0, %2, %cst {dimension_numbers = #tpu.dot_dimension_numbers<[1], [0], [0], [1], [0, 0, 1, 1], [], []>} : vector<16x32xf32>, vector<32x256xf32>, vector<16x256xf32> -> vector<16x256xf32>
    %c0_4 = arith.constant 0 : index
    %c0_5 = arith.constant 0 : index
    %4 = vector.load %arg4[%c0_4, %c0_5] : memref<16x1xf32, #tpu.memory_space<vmem>>, vector<16x1xf32>
    %5 = vector.broadcast %4 : vector<16x1xf32> to vector<16x256xf32>
    %6 = arith.addf %3, %5 : vector<16x256xf32>
    %cst_6 = arith.constant 0.000000e+00 : f32
    %7 = vector.broadcast %cst_6 : f32 to vector<16x256xf32>
    %8 = arith.maximumf %6, %7 : vector<16x256xf32>
    %c0_7 = arith.constant 0 : index
    %c0_8 = arith.constant 0 : index
    %c0_9 = arith.constant 0 : index
    %9 = vector.load %arg5[%c0_7, %c0_8, %c0_9] : memref<1x16x256xf32, #tpu.memory_space<vmem>>, vector<1x16x256xf32>
    %10 = vector.shape_cast %9 : vector<1x16x256xf32> to vector<16x256xf32>
    %11 = vector.shape_cast %8 : vector<16x256xf32> to vector<1x16x256xf32>
    tpu.vector_store %arg5[%c0_7, %c0_8, %c0_9], %11 {strides = array<i32>} : memref<1x16x256xf32, #tpu.memory_space<vmem>>, vector<1x16x256xf32>,
    return
  }
  func.func @transform_0(%arg0: i32, %arg1: i32) -> (i32, i32, i32) {
    %c0_i32 = arith.constant 0 : i32
    %c0_i32_0 = arith.constant 0 : i32
    return %arg0, %c0_i32, %arg1 : i32, i32, i32
  }
  func.func @transform_1(%arg0: i32, %arg1: i32) -> (i32, i32) {
    %c0_i32 = arith.constant 0 : i32
    %c0_i32_0 = arith.constant 0 : i32
    %c0_i32_1 = arith.constant 0 : i32
    return %c0_i32, %c0_i32_0 : i32, i32
  }
  func.func @transform_2(%arg0: i32, %arg1: i32) -> (i32, i32) {
    %c0_i32 = arith.constant 0 : i32
    %c0_i32_0 = arith.constant 0 : i32
    %c0_i32_1 = arith.constant 0 : i32
    return %c0_i32, %c0_i32_0 : i32, i32
  }
  func.func @transform_3(%arg0: i32, %arg1: i32) -> (i32, i32, i32) {
    %c0_i32 = arith.constant 0 : i32
    %c0_i32_0 = arith.constant 0 : i32
    return %arg0, %c0_i32, %arg1 : i32, i32, i32
  }
}

</mosaic_0001>

<bundles_post_ra>
// kernel: fpn_linear_forward.1
= control target key start
LH: loop header
LB: loop body
LE: loop exit
PB: predicated region body
PF: predicated region fallthrough
CT: control target
= control target key end

     0   :  { %8 = vsyncpa [#allocation3], 0  ;;  %s557_s12 = smov 0   ;;  %s559_s13 = smov 0   ;;  %s604_s0 = inlined_call_operand.vmem [shape: f32[2,32,256], index: 0, kind: input, shape index: {}]   ;;  %s605_s1 = inlined_call_operand.hbm [shape: f32[16,32], index: 1, kind: input, shape index: {}]   ;;  %s606_s2 = inlined_call_operand.vmem [shape: f32[16,1], index: 2, kind: input, shape index: {}]   ;;  %s607_s3 = inlined_call_operand.vmem [shape: f32[2,16,256], index: 3, kind: output, shape index: {}]  }
   0x1   :  { %s561_s14 = smov 0  }
   0x2 LB: > { %s409_s15 = sadd.s32 4294967295, %s531_s14   ;;  %s26_s16 = sadd.s32 1, %s527_s13  ;;  %s531_s14 = sphi %s561_s14, %s14_s14   ;;  %s527_s13 = sphi %s559_s13, %s609_s13   ;;  %s523_s12 = sphi %s557_s12, %s608_s12  }
   0x3   : > { %p28_p0 = scmp.ge.s32.totalorder %s26_s16, 2  ;;  %p411_p1 = scmp.ge.s32.totalorder %s531_s14, 1 }
   0x4   : > { %p129_p2 = scmp.lt.s32.totalorder %s531_s14, 3  ;;  %p444_p4 = scmp.eq.s32.totalorder %s409_s15, 0 }
   0x5   : > { %s611_s16 = smov (%p28_p0, %s26_s16), 0  ;;  %s140_s19 = sshll.u32 %s605_s1, 4  ;;  %s141_s19 = int_to_ptr.hbm [resolvable:$true] %s140_s19 }
   0x6   : > { %p130_p3 = pnand %p411_p1, %p129_p2  ;;  %s533_s20 = smov [#allocation2]  }
   0x7   : > { %s142_s21 = sshll.u32 %s533_s20, 4  ;;  %s534_s22 = smov 128   ;;  %s143_s21 = int_to_ptr.vmem [resolvable:$true] %s142_s21 }
   0x8   : > { %p440_p5 = pneg %p130_p3  ;;  %s535_s23 = smov 8  }
   0x9   : > { %174 = sbr.rel (%p130_p3) target bundleno = 167 (0xa7), region = 32 }
   0xa   : > { %p441_p6 = pnand %p444_p4, %p440_p5 }
   0xc   : > { %443 = dma.hbm_to_vmem [thread:$0]  (!%p441_p6), %s141_s19, 256, %s143_s21, [#allocation3], %s534_s22, %s534_s22, %s535_s23  }
   0xe   : > { %518 = dma.done.wait (%p444_p4), [#allocation3], 256  }
   0xf   : > { %520 = vsyncadd (%p444_p4), [#allocation3], 4294967040  ;;  %p208_p7 = scmp.lt.s32.totalorder %s523_s12, 1  ;;  %v536_v0 = vmov 0   ;;  %v227_v9 = vld [vmem:[#allocation2] sm:$0xff]  ;;  %vm249_vm0 = vcmask 261120  }
  0x10   : > { %474 = vset.pattern.permute.xlu0 %v536_v0  ;;  %v228_v10 = vld [vmem:[#allocation2 + $0x8] sm:$0xff]  ;;  %v237_v11 = vld [vmem:[%s606_s2] sm:$0xff] }
  0x11   : > { %s613_s12 = smov (!%p208_p7, %s523_s12), 1  ;;  %241 = vperm.xlu0 %474, %v237_v11   ;;  %v238_v12 = vld [vmem:[%s606_s2 + $0x8] sm:$0xff] }
  0x12   : > { %s426_s24 = sshll.u32 %s613_s12, 6  ;;  %s427_s5 = sshll.u32 %s613_s12, 5 }
  0x13   : > { %s215_s27 = scalar_lea.vmem %s604_s0, %s426_s24  ;;  %s225_s8 = scalar_lea.vmem %s607_s3, %s427_s5 }
  0x14   : > { %v235_v1 = vld [vmem:[%s215_s27 + $0x30] sm:$0xff]  ;;  %v236_v2 = vld [vmem:[%s215_s27 + $0x38] sm:$0xff]  ;;  %v233_v3 = vld [vmem:[%s215_s27 + $0x20] sm:$0xff] }
  0x15   : > { %268 = vmatpush.msra.mxu0 %v235_v1  ;;  %428 = vmatpush.msra.mxu2 %v235_v1  ;;  %v234_v4 = vld [vmem:[%s215_s27 + $0x28] sm:$0xff]  ;;  %v231_v5 = vld [vmem:[%s215_s27 + $0x10] sm:$0xff]  ;;  %v232_v6 = vld [vmem:[%s215_s27 + $0x18] sm:$0xff] }
  0x16   : > { %291 = vmatpush.msra.mxu1 %v236_v2  ;;  %432 = vmatpush.msra.mxu3 %v236_v2  ;;  %v229_v7 = vld [vmem:[%s215_s27] sm:$0xff]  ;;  %v230_v8 = vld [vmem:[%s215_s27 + $0x8] sm:$0xff] }
  0x17   : > { %269 = vmatpush.msra.mxu0 %v233_v3  ;;  %429 = vmatpush.msra.mxu2 %v233_v3 }
  0x18   : > { %292 = vmatpush.msra.mxu1 %v234_v4  ;;  %433 = vmatpush.msra.mxu3 %v234_v4 }
  0x19   : > { %270 = vmatpush.msra.mxu0 %v231_v5  ;;  %430 = vmatpush.msra.mxu2 %v231_v5 }
  0x1a   : > { %293 = vmatpush.msra.mxu1 %v232_v6  ;;  %434 = vmatpush.msra.mxu3 %v232_v6 }
  0x1b   : > { %271 = vmatpush.msra.mxu0 %v229_v7  ;;  %431 = vmatpush.msra.mxu2 %v229_v7 }
  0x1c   : > { %294 = vmatpush.msra.mxu1 %v230_v8  ;;  %435 = vmatpush.msra.mxu3 %v230_v8 }
  0x1d   : > { %420 = vmatmul.msk.f32.vlgmr.msra.gmra.mxu0 %vm249_vm0, %v227_v9  ;;  %421 = vmatmul.msk.f32.vlgmr.msra.gmra.mxu2 %vm249_vm0, %v228_v10 }
  0x1e   : > { %422 = vmatmul.msk.f32.vlgmr.msra.gmra.mxu1 %vm249_vm0, %v227_v9  ;;  %423 = vmatmul.msk.f32.vlgmr.msra.gmra.mxu3 %vm249_vm0, %v228_v10 }
  0x1f   : > { %246 = vperm.xlu0 %474, %v238_v12  }
  0x83   : > { %v242_v13 = vpop.permute.xlu0 %241 }
  0x91   : > { %v247_v20 = vpop.permute.xlu0 %246 }
  0x9a   : > { %v273_v14 = vpop.f32.mrf.mxu0 }
  0x9b   : > { %v274_v15 = vadd.f32 %v273_v14, %v242_v13  ;;  %v296_v16 = vpop.f32.mrf.mxu1 }
  0x9c   : > { %v297_v17 = vadd.f32 %v296_v16, %v242_v13 }
  0x9d   : > { %v302_v18 = vmax.f32 %v274_v15, 0.0 }
  0x9e   : > { %v303_v19 = vmax.f32 %v297_v17, 0.0 }
  0x9f   : > { %306 = vst [vmem:[%s225_s8] sm:$0xff] %v302_v18 }
  0xa0   : > { %307 = vst [vmem:[%s225_s8 + $0x8] sm:$0xff] %v303_v19  ;;  %v276_v21 = vpop.f32.mrf.mxu2 }
  0xa1   : > { %v277_v22 = vadd.f32 %v276_v21, %v247_v20  ;;  %v299_v23 = vpop.f32.mrf.mxu3 }
  0xa2   : > { %v300_v24 = vadd.f32 %v299_v23, %v247_v20 }
  0xa3   : > { %v304_v25 = vmax.f32 %v277_v22, 0.0 }
  0xa4   : > { %v305_v26 = vmax.f32 %v300_v24, 0.0 }
  0xa5   : > { %308 = vst [vmem:[%s225_s8 + $0x10] sm:$0xff] %v304_v25 }
  0xa6   : > { %309 = vst [vmem:[%s225_s8 + $0x18] sm:$0xff] %v305_v26 }
  0xa7 PF: > { %s14_s14 = sadd.s32 1, %s531_s14   ;;  %s608_s12 = smov %s527_s13 }
  0xa8   : > { %p11_p8 = scmp.ge.s32.totalorder %s14_s14, 4   ;;  %s609_s13 = smov %s611_s16 }
  0xaa   :  { %13 = sbr.rel (!%p11_p8) target bundleno = 2 (0x2), region = 67 }
  0xaf   :  { %340 = vsyncpa [#allocation3], 1 }
  0xb0   :  { %342 = vsyncpa [#allocation3 + $0x1], 1 }

</bundles_post_ra>
